<compile_context>
chip_gen: v7x
topology: tpu7x:2x2x1
jax: 0.10.0
libtpu: 0.0.40
codegen_flags: <defaults>
</compile_context>

<pallas_src>
from functools import partial

import jax
import jax.numpy as jnp
from jax.experimental import pallas as pl
from jax.experimental.pallas import tpu as pltpu


def _sigmoid_kernel(x_ref, o_ref):
    # Upcast to f32 for the math (required on v5e, better accuracy everywhere),
    # store back in the native output dtype.
    x = x_ref[...].astype(jnp.float32)
    y = pl.reciprocal(1.0 + jnp.exp(-x), approx=False)  # exp + recip -> EUP slot
    o_ref[...] = y.astype(o_ref.dtype)


def _round_up(v: int, m: int) -> int:
    return -(-v // m) * m


def _pick_width(n: int) -> int | None:
    """Largest multiple-of-128 divisor of n (preferring ones giving >= 8 rows)."""
    candidates = [w for w in (8192, 4096, 2048, 1024, 512, 256, 128) if n % w == 0]
    for w in candidates:
        if n // w >= 8:  # prefer a width that still gives >= 8 sublane rows
            return w
    return candidates[0] if candidates else None


@partial(jax.jit, static_argnames=("target_block_bytes",))
def sigmoid_pallas(x: jax.Array, *, target_block_bytes: int = 2 * 1024 * 1024) -> jax.Array:
    """Elementwise sigmoid via a Pallas TPU kernel. Preserves shape & dtype."""
    if not jnp.issubdtype(x.dtype, jnp.floating):
        raise ValueError("Sigmoid expects a floating-point input dtype.")

    orig_shape = x.shape
    dtype = x.dtype
    n = x.size
    itemsize = jnp.dtype(dtype).itemsize

    # --- Choose a lane-dense 2D layout (rows, width), width a multiple of 128.
    width = _pick_width(n)
    if width is not None:
        # Free reshape, no padding, no extra HBM passes.
        rows = n // width
        x2d = x.reshape(rows, width)
        padded = False
    else:
        # Rare fallback: element count not a multiple of 128 -> pad the tail.
        width = 128
        rows = -(-n // width)
        x2d = jnp.pad(x.reshape(-1), (0, rows * width - n)).reshape(rows, width)
        padded = True

    # --- Pick a row tile: ~target_block_bytes per block, multiple of 8 rows,
    #     and keep at least 2 grid steps when possible (v7x megacore).
    bytes_per_row = width * itemsize
    if rows <= 8:
        tile_r = rows                      # full-extent block (legal for any size)
    else:
        tile_r = max(8, (min(target_block_bytes // bytes_per_row, rows) // 8) * 8)
        half_rows = max(8, _round_up(-(-rows // 2), 8))
        tile_r = min(tile_r, half_rows)    # => grid of at least ~2 steps

    grid = (pl.cdiv(rows, tile_r),)        # cdiv grid: partial last block is masked

    out2d = pl.pallas_call(
        _sigmoid_kernel,
        out_shape=jax.ShapeDtypeStruct((rows, width), dtype),
        grid_spec=pltpu.PrefetchScalarGridSpec(
            num_scalar_prefetch=0,
            grid=grid,
            in_specs=[pl.BlockSpec((tile_r, width), lambda i: (i, 0))],
            out_specs=pl.BlockSpec((tile_r, width), lambda i: (i, 0)),
        ),
        compiler_params=pltpu.CompilerParams(
            dimension_semantics=("parallel",),
        ),
    )(x2d)

    if padded:
        return out2d.reshape(-1)[:n].reshape(orig_shape)
    return out2d.reshape(orig_shape)


if __name__ == "__main__":
    key = jax.random.PRNGKey(0)
    # Small shape consistent with a conv-style input (batch=2, channels=4, 16x16).
    x = jax.random.normal(key, (2, 4, 16, 16), dtype=jnp.float32)

    y = jax.block_until_ready(sigmoid_pallas(x))

    # Correctness check against plain JAX reference.
    y_ref = 1.0 / (1.0 + jnp.exp(-x))
    assert y.shape == x.shape and y.dtype == x.dtype
    assert float(jnp.max(jnp.abs(y - y_ref))) < 1e-6

    print("KERNEL_OK")
</pallas_src>

<mosaic_0001>
module attributes {stable_mosaic.version = 11 : i64} {
  func.func @_sigmoid_kernel(%arg0: i32, %arg1: memref<8x256xf32, #tpu.memory_space<vmem>>, %arg2: memref<8x256xf32, #tpu.memory_space<vmem>>) attributes {dimension_semantics = [#tpu.dimension_semantics<parallel>], iteration_bounds = array<i64: 1>, scalar_prefetch = 0 : i64, scratch_operands = 0 : i64, tpu.core_type = #tpu.core_type<tc>, window_params = [{transform_indices = @transform_0, window_bounds = array<i64: 8, 256>}, {transform_indices = @transform_1, window_bounds = array<i64: 8, 256>}]} {
    %c0 = arith.constant 0 : index
    %c0_0 = arith.constant 0 : index
    %0 = vector.load %arg1[%c0, %c0_0] : memref<8x256xf32, #tpu.memory_space<vmem>>, vector<8x256xf32>
    %cst = arith.constant 0.000000e+00 : f32
    %1 = vector.broadcast %cst : f32 to vector<8x256xf32>
    %2 = arith.subf %1, %0 : vector<8x256xf32>
    %3 = math.exp %2 : vector<8x256xf32>
    %cst_1 = arith.constant 1.000000e+00 : f32
    %4 = vector.broadcast %cst_1 : f32 to vector<8x256xf32>
    %5 = arith.addf %4, %3 : vector<8x256xf32>
    %6 = tpu.reciprocal %5 : vector<8x256xf32> -> vector<8x256xf32>
    %c0_2 = arith.constant 0 : index
    %c0_3 = arith.constant 0 : index
    %7 = vector.load %arg2[%c0_2, %c0_3] : memref<8x256xf32, #tpu.memory_space<vmem>>, vector<8x256xf32>
    tpu.vector_store %arg2[%c0_2, %c0_3], %6 {strides = array<i32>} : memref<8x256xf32, #tpu.memory_space<vmem>>, vector<8x256xf32>,
    return
  }
  func.func @transform_0(%arg0: i32) -> (i32, i32) {
    %c0_i32 = arith.constant 0 : i32
    %c0_i32_0 = arith.constant 0 : i32
    return %arg0, %c0_i32 : i32, i32
  }
  func.func @transform_1(%arg0: i32) -> (i32, i32) {
    %c0_i32 = arith.constant 0 : i32
    %c0_i32_0 = arith.constant 0 : i32
    return %arg0, %c0_i32 : i32, i32
  }
}

</mosaic_0001>

<bundles_post_ra>
// kernel: sigmoid_pallas.1
= control target key start
LH: loop header
LB: loop body
LE: loop exit
PB: predicated region body
PF: predicated region fallthrough
CT: control target
= control target key end

     0   :  { %s56_s0 = inlined_call_operand.vmem [shape: f32[8,256], index: 0, kind: input, shape index: {}]   ;;  %s57_s1 = inlined_call_operand.vmem [shape: f32[8,256], index: 1, kind: output, shape index: {}]  }
   0x1   :  { %v8_v0 = vld [vmem:[%s56_s0] sm:$0xff]  ;;  %v9_v1 = vld [vmem:[%s56_s0 + $0x8] sm:$0xff] }
   0x2   :  { %v10_v2 = vsub.f32 0.0, %v8_v0  ;;  %v11_v3 = vsub.f32 0.0, %v9_v1 }
   0x4   :  { %v12_v4 = vmul.f32 1.442695, %v10_v2  ;;  %v14_v5 = vmul.f32 1.442695, %v11_v3 }
   0x6   :  { %26 = vpow2.f32 %v12_v4 }
   0x7   :  { %28 = vpow2.f32 %v14_v5 }
  0x10   :  { %v27_v6 = vpop.eup %26 }
  0x11   :  { %v29_v7 = vpop.eup %28  ;;  %v16_v8 = vadd.f32 1.0, %v27_v6 }
  0x12   :  { %v17_v9 = vadd.f32 1.0, %v29_v7 }
  0x13   :  { %30 = vrcp.f32 %v16_v8 }
  0x14   :  { %32 = vrcp.f32 %v17_v9 }
  0x1d   :  { %v31_v10 = vpop.eup %30 }
  0x1e   :  { %v33_v11 = vpop.eup %32  ;;  %20 = vst [vmem:[%s57_s1] sm:$0xff] %v31_v10 }
  0x1f   :  { %21 = vst [vmem:[%s57_s1 + $0x8] sm:$0xff] %v33_v11 }

</bundles_post_ra>
